<compile_context>
chip_gen: v7x
topology: tpu7x:2x2x1
jax: 0.10.0
libtpu: 0.0.40
codegen_flags: <defaults>
</compile_context>

<pallas_src>
import functools

import jax
import jax.numpy as jnp
from jax.experimental import pallas as pl
from jax.experimental.pallas import tpu as pltpu

_LANE = 128
_SUBLANE = 8
_MAX_BLOCK_BYTES = 8 * 1024 * 1024   # per-input, per-block DMA payload ceiling
_MAX_CHUNKS = 64                     # bound on in-kernel unroll when D is tiled


def _vmem_budget():
    """Generation-aware scoped-VMEM ceiling and per-input block-size target."""
    try:
        cap = int(pltpu.get_tpu_info().vmem_capacity_bytes)
    except Exception:
        cap = 64 << 20  # conservative (v7x-sized) fallback
    cap_limit = (cap * 3) // 4                        # 96 MiB on v5e/v6e, 48 MiB on v7x
    target_block = min(_MAX_BLOCK_BYTES, cap_limit // 8)  # 8 MiB / 6 MiB per input block
    return cap_limit, target_block


def _kernel_single(x0_ref, x1_ref, cos_ref, *, eps):
    """D fits in one block: no accumulators, no init/finalize branches."""
    x0 = x0_ref[...].astype(jnp.float32)
    x1 = x1_ref[...].astype(jnp.float32)
    # Per-row reductions over the feature (lane) axis; keepdims keeps
    # everything 2-D (tb, 1) so it maps cleanly onto the (8,128) vreg layout.
    w12 = jnp.sum(x0 * x1, axis=1, keepdims=True)
    w1 = jnp.sum(x0 * x0, axis=1, keepdims=True)
    w2 = jnp.sum(x1 * x1, axis=1, keepdims=True)
    # 1/max(sqrt(w), eps) == min(rsqrt(w), 1/eps)  -> EUP rsqrt, no divide.
    inv_eps = jnp.float32(1.0 / eps)
    inv0 = jnp.minimum(jax.lax.rsqrt(w1), inv_eps)
    inv1 = jnp.minimum(jax.lax.rsqrt(w2), inv_eps)
    cos_ref[...] = w12 * inv0 * inv1


def _kernel_tiled(x0_ref, x1_ref, cos_ref, w12_acc, w1_acc, w2_acc, *, eps):
    """Feature axis tiled: lane-wide (tb,128) accumulators, one XLU reduce at the end."""
    k = pl.program_id(1)
    x0 = x0_ref[...].astype(jnp.float32)
    x1 = x1_ref[...].astype(jnp.float32)
    tk = x0.shape[1]
    n_chunks = tk // _LANE  # tk is guaranteed to be a multiple of 128 here

    def fold(a, b):
        # Fold (tb, tk) -> (tb, 128) with lane-aligned static slices: pure VPU adds.
        out = a[:, :_LANE] * b[:, :_LANE]
        for j in range(1, n_chunks):
            s = slice(j * _LANE, (j + 1) * _LANE)
            out = out + a[:, s] * b[:, s]
        return out

    p12 = fold(x0, x1)
    p1 = fold(x0, x0)
    p2 = fold(x1, x1)

    @pl.when(k == 0)
    def _init():
        w12_acc[...] = p12
        w1_acc[...] = p1
        w2_acc[...] = p2

    @pl.when(k > 0)
    def _accumulate():
        w12_acc[...] += p12
        w1_acc[...] += p1
        w2_acc[...] += p2

    @pl.when(k == pl.num_programs(1) - 1)
    def _finalize():
        # Single cross-lane (XLU) reduction per batch block, only at the end.
        w12 = jnp.sum(w12_acc[...], axis=1, keepdims=True)
        w1 = jnp.sum(w1_acc[...], axis=1, keepdims=True)
        w2 = jnp.sum(w2_acc[...], axis=1, keepdims=True)
        inv_eps = jnp.float32(1.0 / eps)
        inv0 = jnp.minimum(jax.lax.rsqrt(w1), inv_eps)
        inv1 = jnp.minimum(jax.lax.rsqrt(w2), inv_eps)
        cos_ref[...] = w12 * inv0 * inv1


def _choose_tiles(B, D, itemsize, target_bytes):
    # Feature (lane) axis: full extent if small or not 128-aligned, otherwise
    # the largest 128-multiple divisor of D whose 8-row slab fits the target.
    tk = D
    if D % _LANE == 0:
        while (tk * _SUBLANE * itemsize > target_bytes
               and tk % 2 == 0 and (tk // 2) % _LANE == 0):
            tk //= 2
        if tk < D:
            # Feature axis is tiled (D is huge): bound the in-kernel unroll width
            # of the lane-wide fold; the grid's reduction axis does the rest.
            while tk > _LANE * _MAX_CHUNKS and tk % 2 == 0 and (tk // 2) % _LANE == 0:
                tk //= 2
    nk = D // tk

    # Batch (sublane) axis: as many rows as hit the payload target, rounded to
    # a multiple of 8. Keep >= 2 batch blocks whenever B allows it so the
    # "parallel" batch axis can be sharded across v7x's two TensorCores.
    rows = max(_SUBLANE, target_bytes // max(1, tk * itemsize))
    if rows >= B:
        half = -(-B // 2)                          # ceil(B / 2)
        tb = -(-half // _SUBLANE) * _SUBLANE       # round up to a sublane multiple
        if tb >= B:                                # can't usefully split (B <= 8)
            tb = B
    else:
        tb = max(_SUBLANE, (rows // _SUBLANE) * _SUBLANE)
    nb = pl.cdiv(B, tb)
    return tb, nb, tk, nk


def negative_cosine_similarity(x0: jax.Array, x1: jax.Array, *, eps: float = 1e-8,
                               block_rows: int | None = None,
                               block_cols: int | None = None) -> jax.Array:
    """Pallas TPU equivalent of  -cosine_similarity(x0, x1, dim=1, eps).mean().

    x0, x1: (B, D) arrays (any float dtype; math is done in f32). Returns f32 scalar.
    """
    assert x0.shape == x1.shape and x0.ndim == 2, (x0.shape, x1.shape)
    B, D = x0.shape
    itemsize = max(jnp.dtype(x0.dtype).itemsize, jnp.dtype(x1.dtype).itemsize)

    cap_limit, target_bytes = _vmem_budget()
    tb, nb, tk, nk = _choose_tiles(B, D, itemsize, target_bytes)
    if block_rows is not None:  # explicit override (mainly for testing)
        tb = block_rows
        assert tb == B or tb % _SUBLANE == 0
        nb = pl.cdiv(B, tb)
    if block_cols is not None:
        tk = block_cols
        assert tk == D or (tk % _LANE == 0 and D % tk == 0)
        nk = D // tk
    b_pad = nb * tb  # output padded; garbage tail rows are sliced off below

    # Real footprint: 2 inputs x 2 pipeline buffers x block + tiny output +
    # (nk>1 only) three lane-wide f32 accumulators; 1.5x margin, clamped to a
    # generation-aware ceiling (v7x has only 64 MiB physical VMEM per TC).
    block_bytes = tb * tk * itemsize
    scratch_bytes = 0 if nk == 1 else 3 * tb * _LANE * 4
    needed = 2 * 2 * block_bytes + 2 * tb * 4 + scratch_bytes
    vmem_limit = int(min(cap_limit, max(32 << 20, needed * 3 // 2 + (2 << 20))))

    cost = pl.CostEstimate(
        flops=6 * B * D,
        transcendentals=2 * B,
        bytes_accessed=2 * B * D * itemsize + 4 * B,
    )

    if nk == 1:
        grid = (nb,)
        in_spec = pl.BlockSpec((tb, D), lambda i: (i, 0))
        out_spec = pl.BlockSpec((tb, 1), lambda i: (i, 0))
        kernel = functools.partial(_kernel_single, eps=eps)
        scratch = []
        semantics = ("parallel",)
    else:
        grid = (nb, nk)
        in_spec = pl.BlockSpec((tb, tk), lambda i, k: (i, k))
        out_spec = pl.BlockSpec((tb, 1), lambda i, k: (i, 0))
        kernel = functools.partial(_kernel_tiled, eps=eps)
        scratch = [pltpu.VMEM((tb, _LANE), jnp.float32)] * 3
        semantics = ("parallel", "arbitrary")

    cos = pl.pallas_call(
        kernel,
        out_shape=jax.ShapeDtypeStruct((b_pad, 1), jnp.float32),
        grid_spec=pltpu.PrefetchScalarGridSpec(
            num_scalar_prefetch=0,
            grid=grid,
            in_specs=[in_spec, in_spec],
            out_specs=out_spec,
            scratch_shapes=scratch,
        ),
        compiler_params=pltpu.CompilerParams(
            dimension_semantics=semantics,
            vmem_limit_bytes=vmem_limit,
        ),
        cost_estimate=cost,
    )(x0, x1)

    # Final -mean over the true batch rows (padded tail rows are dropped).
    return -jnp.mean(cos[:B, 0])


if __name__ == "__main__":
    key = jax.random.PRNGKey(0)
    k0, k1, k2, k3, k4, k5 = jax.random.split(key, 6)

    def ref_loss(a, b, eps=1e-8):
        a = a.astype(jnp.float32)
        b = b.astype(jnp.float32)
        w12 = jnp.sum(a * b, axis=1)
        n0 = jnp.maximum(jnp.sqrt(jnp.sum(a * a, axis=1)), eps)
        n1 = jnp.maximum(jnp.sqrt(jnp.sum(b * b, axis=1)), eps)
        return -jnp.mean(w12 / (n0 * n1))

    # 1) Small single-block fast path (nk == 1, nb == 1): no accumulators.
    B, D = 8, 32
    x0 = jax.random.normal(k0, (B, D), dtype=jnp.float32)
    x1 = jax.random.normal(k1, (B, D), dtype=jnp.float32)
    loss = negative_cosine_similarity(x0, x1)
    jax.block_until_ready(loss)
    assert jnp.allclose(loss, ref_loss(x0, x1), atol=1e-5, rtol=1e-5), (
        loss, ref_loss(x0, x1))

    # 2) Forced tiled path: feature axis reduced across grid steps with
    #    lane-wide accumulators (grid=(4,2), batch "parallel", feature "arbitrary").
    B2, D2 = 32, 256
    y0 = jax.random.normal(k2, (B2, D2), dtype=jnp.float32)
    y1 = jax.random.normal(k3, (B2, D2), dtype=jnp.float32)
    loss2 = negative_cosine_similarity(y0, y1, block_rows=8, block_cols=128)
    jax.block_until_ready(loss2)
    assert jnp.allclose(loss2, ref_loss(y0, y1), atol=1e-5, rtol=1e-5), (
        loss2, ref_loss(y0, y1))

    # 3) Auto tiling with a ragged batch (B not a multiple of 8, D not 128-aligned):
    #    exercises the >=2-batch-block megacore split and padded-tail handling.
    B3, D3 = 10, 33
    z0 = jax.random.normal(k4, (B3, D3), dtype=jnp.float32)
    z1 = jax.random.normal(k5, (B3, D3), dtype=jnp.float32)
    loss3 = negative_cosine_similarity(z0, z1)
    jax.block_until_ready(loss3)
    assert jnp.allclose(loss3, ref_loss(z0, z1), atol=1e-5, rtol=1e-5), (
        loss3, ref_loss(z0, z1))

    print("KERNEL_OK")
</pallas_src>

<mosaic_0001>
module attributes {stable_mosaic.version = 11 : i64} {
  func.func @_kernel_single(%arg0: i32, %arg1: memref<8x32xf32, #tpu.memory_space<vmem>>, %arg2: memref<8x32xf32, #tpu.memory_space<vmem>>, %arg3: memref<8x1xf32, #tpu.memory_space<vmem>>) attributes {dimension_semantics = [#tpu.dimension_semantics<parallel>], iteration_bounds = array<i64: 1>, scalar_prefetch = 0 : i64, scratch_operands = 0 : i64, tpu.core_type = #tpu.core_type<tc>, window_params = [{transform_indices = @transform_0, window_bounds = array<i64: 8, 32>}, {transform_indices = @transform_1, window_bounds = array<i64: 8, 32>}, {transform_indices = @transform_2, window_bounds = array<i64: 8, 1>}]} {
    %c0 = arith.constant 0 : index
    %c0_0 = arith.constant 0 : index
    %0 = vector.load %arg1[%c0, %c0_0] : memref<8x32xf32, #tpu.memory_space<vmem>>, vector<8x32xf32>
    %c0_1 = arith.constant 0 : index
    %c0_2 = arith.constant 0 : index
    %1 = vector.load %arg2[%c0_1, %c0_2] : memref<8x32xf32, #tpu.memory_space<vmem>>, vector<8x32xf32>
    %2 = arith.mulf %0, %1 : vector<8x32xf32>
    %cst = arith.constant dense<0.000000e+00> : vector<8xf32>
    %3 = vector.multi_reduction <add>, %2, %cst [1] : vector<8x32xf32> to vector<8xf32>
    %4 = vector.shape_cast %3 : vector<8xf32> to vector<8x1xf32>
    %5 = arith.mulf %0, %0 : vector<8x32xf32>
    %cst_3 = arith.constant dense<0.000000e+00> : vector<8xf32>
    %6 = vector.multi_reduction <add>, %5, %cst_3 [1] : vector<8x32xf32> to vector<8xf32>
    %7 = vector.shape_cast %6 : vector<8xf32> to vector<8x1xf32>
    %8 = arith.mulf %1, %1 : vector<8x32xf32>
    %cst_4 = arith.constant dense<0.000000e+00> : vector<8xf32>
    %9 = vector.multi_reduction <add>, %8, %cst_4 [1] : vector<8x32xf32> to vector<8xf32>
    %10 = vector.shape_cast %9 : vector<8xf32> to vector<8x1xf32>
    %11 = math.rsqrt %7 : vector<8x1xf32>
    %cst_5 = arith.constant 1.000000e+08 : f32
    %12 = vector.broadcast %cst_5 : f32 to vector<8x1xf32>
    %13 = arith.minimumf %11, %12 : vector<8x1xf32>
    %14 = math.rsqrt %10 : vector<8x1xf32>
    %cst_6 = arith.constant 1.000000e+08 : f32
    %15 = vector.broadcast %cst_6 : f32 to vector<8x1xf32>
    %16 = arith.minimumf %14, %15 : vector<8x1xf32>
    %17 = arith.mulf %4, %13 : vector<8x1xf32>
    %18 = arith.mulf %17, %16 : vector<8x1xf32>
    %c0_7 = arith.constant 0 : index
    %c0_8 = arith.constant 0 : index
    %19 = vector.load %arg3[%c0_7, %c0_8] : memref<8x1xf32, #tpu.memory_space<vmem>>, vector<8x1xf32>
    tpu.vector_store %arg3[%c0_7, %c0_8], %18 {strides = array<i32>} : memref<8x1xf32, #tpu.memory_space<vmem>>, vector<8x1xf32>,
    return
  }
  func.func @transform_0(%arg0: i32) -> (i32, i32) {
    %c0_i32 = arith.constant 0 : i32
    %c0_i32_0 = arith.constant 0 : i32
    return %arg0, %c0_i32 : i32, i32
  }
  func.func @transform_1(%arg0: i32) -> (i32, i32) {
    %c0_i32 = arith.constant 0 : i32
    %c0_i32_0 = arith.constant 0 : i32
    return %arg0, %c0_i32 : i32, i32
  }
  func.func @transform_2(%arg0: i32) -> (i32, i32) {
    %c0_i32 = arith.constant 0 : i32
    %c0_i32_0 = arith.constant 0 : i32
    return %arg0, %c0_i32 : i32, i32
  }
}

</mosaic_0001>

<bundles_post_ra>
// kernel: tpu_custom_call.1
= control target key start
LH: loop header
LB: loop body
LE: loop exit
PB: predicated region body
PF: predicated region fallthrough
CT: control target
= control target key end

     0   :  { %7 = vsyncpa [#allocation3], 0  ;;  %s162_s0 = inlined_call_operand.hbm [shape: f32[8,32], index: 0, kind: input, shape index: {}]   ;;  %s163_s1 = inlined_call_operand.hbm [shape: f32[8,32], index: 1, kind: input, shape index: {}]   ;;  %s164_s2 = inlined_call_operand.vmem [shape: f32[8,1], index: 2, kind: output, shape index: {}]  }
   0x1   :  { %8 = vsyncpa [#allocation5], 0  ;;  %s118_s9 = smov [#allocation2]   ;;  %s119_s11 = smov [#allocation4]  }
   0x2   :  { %s15_s10 = sshll.u32 %s118_s9, 4  ;;  %s25_s12 = sshll.u32 %s119_s11, 4  ;;  %s16_s10 = int_to_ptr.vmem [resolvable:$true] %s15_s10  ;;  %s26_s12 = int_to_ptr.vmem [resolvable:$true] %s25_s12 }
   0x3   :  { %s70_s15 = scalar_lea.hbm %s162_s0, 128 }
   0x4   :  { %p71_p0 = scmp.ne.s32.totalorder %s162_s0, %s70_s15  ;;  %p74_p1 = scmp.lt.u32.totalorder %s70_s15, %s162_s0 }
   0x6   :  { %p76_p2 = pnand %p74_p1, %p71_p0 }
   0x8   :  { %79 = shalt.err (!%p76_p2)
}
   0x9   :  { %s80_s20 = scalar_lea.vmem %s16_s10, 128  ;;  %p85_p4 = scmp.lt.s32.totalorder %s16_s10, %s16_s10 }
   0xa   :  { %p81_p3 = scmp.ne.s32.totalorder %s16_s10, %s80_s20  ;;  %p86_p5 = scmp.lt.s32.totalorder %s80_s20, %s80_s20 }
   0xc   :  { %p87_p6 = por %p86_p5, %p85_p4 }
   0xe   :  { %p88_p7 = pnand %p87_p6, %p81_p3 }
  0x10   :  { %91 = shalt.err (!%p88_p7)
}
  0x11   :  { %18 = dma.hbm_to_vmem [thread:$0]  %s162_s0, 128, %s16_s10, [#allocation3]  }
  0x12   :  { %s92_s25 = scalar_lea.hbm %s163_s1, 128 }
  0x13   :  { %p93_p8 = scmp.ne.s32.totalorder %s163_s1, %s92_s25  ;;  %p96_p9 = scmp.lt.u32.totalorder %s92_s25, %s163_s1 }
  0x15   :  { %p98_p10 = pnand %p96_p9, %p93_p8 }
  0x17   :  { %101 = shalt.err (!%p98_p10)
}
  0x18   :  { %s102_s30 = scalar_lea.vmem %s26_s12, 128  ;;  %p107_p12 = scmp.lt.s32.totalorder %s26_s12, %s26_s12 }
  0x19   :  { %p103_p11 = scmp.ne.s32.totalorder %s26_s12, %s102_s30  ;;  %p108_p13 = scmp.lt.s32.totalorder %s102_s30, %s102_s30 }
  0x1b   :  { %p109_p0 = por %p108_p13, %p107_p12 }
  0x1d   :  { %p110_p1 = pnand %p109_p0, %p103_p11 }
  0x1f   :  { %113 = shalt.err (!%p110_p1)
}
  0x20   :  { %28 = dma.hbm_to_vmem [thread:$0]  %s163_s1, 128, %s26_s12, [#allocation5]  }
  0x21   :  { %114 = dma.done.wait [#allocation3], 128  }
  0x22   :  { %115 = vsyncadd [#allocation3], 4294967168 }
  0x23   :  { %116 = dma.done.wait [#allocation5], 128  }
  0x24   :  { %117 = vsyncadd [#allocation5], 4294967168  ;;  %v35_v0 = vld [vmem:[#allocation2] sm:$0xff]  ;;  %vm38_vm0 = vcmask 261120   ;;  %v36_v1 = vld [vmem:[#allocation4] sm:$0xff]  ;;  %vm56_vm1 = vcmask 7168  }
  0x25   :  { %v42_v2 = vmul.f32 %v35_v0, %v35_v0  ;;  %v46_v3 = vmul.f32 %v36_v1, %v36_v1  ;;  %v37_v4 = vmul.f32 %v36_v1, %v35_v0 }
  0x27   :  { %v43_v5 = vsel %vm38_vm0, %v42_v2, 0.0  ;;  %v39_v6 = vsel %vm38_vm0, %v37_v4, 0.0  ;;  %v47_v7 = vsel %vm38_vm0, %v46_v3, 0.0 }
  0x28   :  { %44 = vadd.xlane.f32.xlu0 %v43_v5  ;;  %40 = vadd.xlane.f32.xlu1 %v39_v6 }
  0x2c   :  { %48 = vadd.xlane.f32.xlu0 %v47_v7 }
  0xb5   :  { %v45_v8 = vpop.xlane.xlu0 %44  ;;  %v41_v12 = vpop.xlane.xlu1 %40 }
  0xb6   :  { %66 = vrsqrt.f32 %v45_v8 }
  0xb9   :  { %v49_v9 = vpop.xlane.xlu0 %48 }
  0xba   :  { %68 = vrsqrt.f32 %v49_v9 }
  0xc0   :  { %v67_v10 = vpop.eup %66 }
  0xc1   :  { %v51_v11 = vmin.f32 %v67_v10, 1e+08 }
  0xc3   :  { %v54_v15 = vmul.f32 %v51_v11, %v41_v12 }
  0xc4   :  { %v69_v13 = vpop.eup %68 }
  0xc5   :  { %v53_v14 = vmin.f32 %v69_v13, 1e+08 }
  0xc7   :  { %v55_v16 = vmul.f32 %v54_v15, %v53_v14 }
  0xc9   :  { %57 = vst.msk [vmem:[%s164_s2] sm:$0xff] %vm56_vm1, %v55_v16 }
  0xca   :  { %62 = vsyncpa [#allocation3], 1 }
  0xcb   :  { %63 = vsyncpa [#allocation5], 1 }

</bundles_post_ra>
